<compile_context>
chip_gen: v7x
topology: tpu7x:2x2x1
jax: 0.10.0
libtpu: 0.0.40
codegen_flags: <defaults>
</compile_context>

<pallas_src>
import jax
import jax.numpy as jnp
import numpy as np
from jax.experimental import pallas as pl
from jax.experimental.pallas import tpu as pltpu  # noqa: F401  (TPU backend)


def _identity_kernel(x_hbm_ref, o_hbm_ref):
    # Output aliases the input HBM buffer (input_output_aliases={0: 0});
    # nothing to compute, nothing to move.
    del x_hbm_ref, o_hbm_ref


def _identity_pallas(x: jax.Array) -> jax.Array:
    """y = x (same shape, same dtype) with zero in-kernel data movement."""
    return pl.pallas_call(
        _identity_kernel,
        out_shape=jax.ShapeDtypeStruct(x.shape, x.dtype),
        # Leave both operands in HBM: no auto-DMA, no VMEM staging.
        in_specs=[pl.BlockSpec(memory_space=pl.ANY)],
        out_specs=pl.BlockSpec(memory_space=pl.ANY),
        # Output 0 shares the buffer of input 0 -> the "copy" is free.
        input_output_aliases={0: 0},
        # Tell XLA's scheduler this custom call costs nothing.
        cost_estimate=pl.CostEstimate(flops=0, transcendentals=0,
                                      bytes_accessed=0),
    )(x)


# Donate the input at the jit boundary so the input/output alias is honored
# without a defensive HBM copy.  Callers that still need `x` afterwards should
# use `identity_keep_input` instead (correct, but may pay one HBM->HBM copy).
identity = jax.jit(_identity_pallas, donate_argnums=0)
identity_keep_input = jax.jit(_identity_pallas)


if __name__ == "__main__":
    key = jax.random.PRNGKey(0)
    # Small NCHW-style input consistent with typical module usage.
    x = jax.random.normal(key, (2, 4, 16, 16), dtype=jnp.float32)

    # Snapshot expected values on the host BEFORE donating the device buffer.
    x_expected = np.asarray(x)

    y = identity(x)          # x's device buffer is donated (aliased to y)
    jax.block_until_ready(y)

    assert y.shape == x_expected.shape, (y.shape, x_expected.shape)
    assert y.dtype == x_expected.dtype, (y.dtype, x_expected.dtype)
    assert np.array_equal(np.asarray(y), x_expected), "identity output mismatch"

    # Also exercise the non-donating variant (caller keeps its input alive).
    x2 = jax.random.normal(jax.random.PRNGKey(0), (2, 4, 16, 16), jnp.float32)
    y2 = identity_keep_input(x2)
    jax.block_until_ready(y2)
    assert bool(jnp.all(y2 == x2)), "identity (non-donated) output mismatch"

    print("KERNEL_OK")
</pallas_src>

<mosaic_0001>
module attributes {stable_mosaic.version = 11 : i64} {
  func.func @_identity_kernel(%arg0: memref<2x4x16x16xf32, #tpu.memory_space<any>>, %arg1: memref<2x4x16x16xf32, #tpu.memory_space<any>>) attributes {dimension_semantics = [], scalar_prefetch = 0 : i64, scratch_operands = 0 : i64, tpu.core_type = #tpu.core_type<tc>} {
    return
  }
}

</mosaic_0001>

<bundles_post_ra>
// kernel: _identity_pallas.1
= control target key start
LH: loop header
LB: loop body
LE: loop exit
PB: predicated region body
PF: predicated region fallthrough
CT: control target
= control target key end

     0   :  { %s16_s0 = inlined_call_operand.hbm [shape: f32[2,4,16,16], index: 0, kind: input, shape index: {}, may-alias: {0,1}]   ;;  %s17_s1 = inlined_call_operand.hbm [shape: f32[2,4,16,16], index: 1, kind: output, shape index: {}, may-alias: {0,1}]  }

</bundles_post_ra>
